<compile_context>
chip_gen: v7x
topology: tpu7x:2x2x1
jax: 0.10.0
libtpu: 0.0.40
codegen_flags: <defaults>
</compile_context>

<pallas_src>
import math

import jax
import jax.numpy as jnp
from jax.experimental import pallas as pl
from jax.experimental.pallas import tpu as pltpu


def _round_up(x, m):
    return (x + m - 1) // m * m


_GELU_C1 = math.sqrt(2.0 / math.pi)
_GELU_C2 = _GELU_C1 * 0.044715


def _gelu_tanh(h):
    # 0.5*h*(1 + tanh(c*(h + 0.044715*h^3))) == h*(0.5 + 0.5*tanh(h*(c1 + c2*h*h)))
    u = h * h
    return h * (0.5 + 0.5 * jnp.tanh(h * (_GELU_C1 + _GELU_C2 * u)))


# ----------------------------------------------------------------------------
# Fused kernel: whole d_ff in one pass (weights VMEM-resident, no accumulator).
# ----------------------------------------------------------------------------
def ffn_fused_kernel(x_ref, w1_ref, b1_ref, w2_ref, b2_ref, o_ref):
    # x: (tm, d_model_p) bf16   w1: (d_model_p, d_ff_p) bf16   b1: (1, d_ff_p) f32
    # w2: (d_ff_p, d_model_p) bf16   b2: (1, d_model_p) f32    o: (tm, d_model_p)
    h = jnp.dot(x_ref[...], w1_ref[...],
                preferred_element_type=jnp.float32) + b1_ref[...]
    g = _gelu_tanh(h)
    # TODO(synk): dropout omitted (eval-mode identity); training-mode dropout
    # would use pltpu.prng_seed + pltpu.stateful_bernoulli on `g`.
    y = jnp.dot(g.astype(w2_ref.dtype), w2_ref[...],
                preferred_element_type=jnp.float32)
    o_ref[...] = (y + b2_ref[...]).astype(o_ref.dtype)


# ----------------------------------------------------------------------------
# Reduction kernel: d_ff tiled as a reduction grid axis, f32 VMEM accumulator.
# ----------------------------------------------------------------------------
def ffn_reduce_kernel(x_ref, w1_ref, b1_ref, w2_ref, b2_ref, o_ref, acc_ref):
    # x: (tm, d_model_p)        w1: (1, d_model_p, tf)  [contiguous k-slab]
    # b1: (1, tf)               w2: (tf, d_model_p)     b2: (1, d_model_p)
    # o:  (tm, d_model_p)       acc: (tm, d_model_p) f32 scratch
    k = pl.program_id(1)

    @pl.when(k == 0)
    def _():
        acc_ref[...] = jnp.zeros_like(acc_ref)

    h = jnp.dot(x_ref[...], w1_ref[0],
                preferred_element_type=jnp.float32) + b1_ref[...]
    g = _gelu_tanh(h)
    # TODO(synk): dropout omitted (eval-mode identity).
    acc_ref[...] += jnp.dot(g.astype(w2_ref.dtype), w2_ref[...],
                            preferred_element_type=jnp.float32)

    @pl.when(k == pl.num_programs(1) - 1)
    def _():
        o_ref[...] = (acc_ref[...] + b2_ref[...]).astype(o_ref.dtype)


def _tpu_vmem_bytes():
    try:
        return int(pltpu.get_tpu_info().vmem_capacity_bytes)
    except Exception:
        return 64 * 1024 * 1024  # conservative: assume v7x-sized VMEM


def positionwise_feed_forward(x, w1, b1, w2, b2, *, tm=None, tf=None,
                              compute_dtype=jnp.bfloat16,
                              force_reduction=False):
    """x: (B, S, d_model); w1: (d_model, d_ff); w2: (d_ff, d_model).

    Linear weights are stored pre-transposed as (in_features, out_features).
    Matmul operands run in `compute_dtype` (bf16 by default); accumulation f32.
    """
    B, S, d_model = x.shape
    d_ff = w1.shape[1]
    M = B * S

    vmem_cap = _tpu_vmem_bytes()
    big_vmem = vmem_cap >= 100 * 1024 * 1024       # v5e/v6e 128 MiB vs v7x 64 MiB
    vmem_limit = int(vmem_cap * 0.7)

    if tm is None:
        tm = 512 if big_vmem else 256
    # Round the clamp up to a multiple of 256 so small-M inputs still present
    # full-height LHS tiles to the 256-wide MXU.
    tm = min(tm, _round_up(M, 256))
    M_p = _round_up(M, tm)

    d_model_p = _round_up(d_model, 128)
    d_ff_128 = _round_up(d_ff, 128)
    itemsize = jnp.dtype(compute_dtype).itemsize

    # Would the fully-fused plan (both weights double-buffered + x/out tiles +
    # f32 GELU temporaries) fit the VMEM budget?
    fused_bytes = (
        2 * 2 * d_model_p * d_ff_128 * itemsize                  # W1 + W2 (x2 bufs)
        + 2 * tm * d_model_p * (itemsize + x.dtype.itemsize)     # x + out tiles
        + 2 * tm * d_ff_128 * 4)                                 # h/g f32 temps
    use_fused = (not force_reduction) and fused_bytes <= int(vmem_limit * 0.8)

    def pad2(a, r, c):
        pr, pc = r - a.shape[0], c - a.shape[1]
        if pr or pc:
            a = jnp.pad(a, ((0, pr), (0, pc)))
        return a

    def pad1(a, n):
        if a.shape[0] != n:
            a = jnp.pad(a, (0, n - a.shape[0]))
        return a

    x2d = pad2(x.reshape(M, d_model).astype(compute_dtype), M_p, d_model_p)
    b2p = pad1(b2.astype(jnp.float32), d_model_p).reshape(1, d_model_p)

    if use_fused:
        d_ff_p = d_ff_128
        w1p = pad2(w1.astype(compute_dtype), d_model_p, d_ff_p)
        w2p = pad2(w2.astype(compute_dtype), d_ff_p, d_model_p)
        b1p = pad1(b1.astype(jnp.float32), d_ff_p).reshape(1, d_ff_p)

        out = pl.pallas_call(
            ffn_fused_kernel,
            out_shape=jax.ShapeDtypeStruct((M_p, d_model_p), x.dtype),
            grid_spec=pltpu.PrefetchScalarGridSpec(
                num_scalar_prefetch=0,
                grid=(M_p // tm,),
                in_specs=[
                    pl.BlockSpec((tm, d_model_p),       lambda i: (i, 0)),  # x rows
                    pl.BlockSpec((d_model_p, d_ff_p),   lambda i: (0, 0)),  # W1 (resident)
                    pl.BlockSpec((1, d_ff_p),           lambda i: (0, 0)),  # b1
                    pl.BlockSpec((d_ff_p, d_model_p),   lambda i: (0, 0)),  # W2 (resident)
                    pl.BlockSpec((1, d_model_p),        lambda i: (0, 0)),  # b2
                ],
                out_specs=pl.BlockSpec((tm, d_model_p), lambda i: (i, 0)),
            ),
            compiler_params=pltpu.CompilerParams(
                dimension_semantics=("parallel",),
                vmem_limit_bytes=vmem_limit,
            ),
        )(x2d, w1p, b1p, w2p, b2p)
    else:
        if tf is None:
            tf = 1024 if big_vmem else 512
        tf = min(_round_up(tf, 128), d_ff_128)
        d_ff_p = _round_up(d_ff, tf)
        kt = d_ff_p // tf

        w1p = pad2(w1.astype(compute_dtype), d_model_p, d_ff_p)
        # Make each k-slab of W1 a single contiguous HBM run: (kt, d_model_p, tf).
        w1r = w1p.reshape(d_model_p, kt, tf).transpose(1, 0, 2)
        w2p = pad2(w2.astype(compute_dtype), d_ff_p, d_model_p)
        b1p = pad1(b1.astype(jnp.float32), d_ff_p).reshape(1, d_ff_p)

        out = pl.pallas_call(
            ffn_reduce_kernel,
            out_shape=jax.ShapeDtypeStruct((M_p, d_model_p), x.dtype),
            grid_spec=pltpu.PrefetchScalarGridSpec(
                num_scalar_prefetch=0,
                grid=(M_p // tm, kt),        # rows parallel, d_ff reduction last
                in_specs=[
                    pl.BlockSpec((tm, d_model_p),      lambda i, k: (i, 0)),
                    pl.BlockSpec((1, d_model_p, tf),   lambda i, k: (k, 0, 0)),
                    pl.BlockSpec((1, tf),              lambda i, k: (0, k)),
                    pl.BlockSpec((tf, d_model_p),      lambda i, k: (k, 0)),
                    pl.BlockSpec((1, d_model_p),       lambda i, k: (0, 0)),
                ],
                out_specs=pl.BlockSpec((tm, d_model_p), lambda i, k: (i, 0)),
                scratch_shapes=[pltpu.VMEM((tm, d_model_p), jnp.float32)],
            ),
            compiler_params=pltpu.CompilerParams(
                dimension_semantics=("parallel", "arbitrary"),
                vmem_limit_bytes=vmem_limit,
            ),
        )(x2d, w1r, b1p, w2p, b2p)

    if M_p != M or d_model_p != d_model:
        out = out[:M, :d_model]
    return out.reshape(B, S, d_model)


def _reference(x, w1, b1, w2, b2):
    h = jnp.einsum("bsd,df->bsf", x, w1) + b1
    g = 0.5 * h * (1.0 + jnp.tanh(_GELU_C1 * (h + 0.044715 * h ** 3)))
    return jnp.einsum("bsf,fd->bsd", g, w2) + b2


def _make_params(key, d_model, d_ff):
    k1, k2, k3, k4 = jax.random.split(key, 4)
    lim1 = 1.0 / math.sqrt(d_model)
    lim2 = 1.0 / math.sqrt(d_ff)
    w1 = jax.random.uniform(k1, (d_model, d_ff), jnp.float32, -lim1, lim1)
    b1 = jax.random.uniform(k2, (d_ff,), jnp.float32, -lim1, lim1)
    w2 = jax.random.uniform(k3, (d_ff, d_model), jnp.float32, -lim2, lim2)
    b2 = jax.random.uniform(k4, (d_model,), jnp.float32, -lim2, lim2)
    return w1, b1, w2, b2


if __name__ == "__main__":
    key = jax.random.PRNGKey(0)

    # Test 1: small BERT-like shapes, fused single-pass path.
    B, S, d_model, d_ff = 2, 8, 32, 128
    kx, kp, kx2, kp2 = jax.random.split(key, 4)
    x = jax.random.normal(kx, (B, S, d_model), dtype=jnp.float32)
    w1, b1, w2, b2 = _make_params(kp, d_model, d_ff)

    y = positionwise_feed_forward(x, w1, b1, w2, b2)
    y = jax.block_until_ready(y)
    y_ref = _reference(x, w1, b1, w2, b2)
    assert y.shape == (B, S, d_model)
    assert jnp.allclose(y, y_ref, atol=2e-2, rtol=2e-2), "fused path mismatch"

    # Test 2: exercise the d_ff-reduction path (multi-k accumulation + padding).
    d_model2, d_ff2 = 64, 384
    x2 = jax.random.normal(kx2, (B, S, d_model2), dtype=jnp.float32)
    w1b, b1b, w2b, b2b = _make_params(kp2, d_model2, d_ff2)
    y2 = positionwise_feed_forward(x2, w1b, b1b, w2b, b2b,
                                   tf=128, force_reduction=True)
    y2 = jax.block_until_ready(y2)
    y2_ref = _reference(x2, w1b, b1b, w2b, b2b)
    assert y2.shape == (B, S, d_model2)
    assert jnp.allclose(y2, y2_ref, atol=2e-2, rtol=2e-2), "reduction path mismatch"

    print("KERNEL_OK")
</pallas_src>

<mosaic_0001>
module attributes {stable_mosaic.version = 11 : i64} {
  func.func @ffn_fused_kernel(%arg0: i32, %arg1: memref<256x128xbf16, #tpu.memory_space<vmem>>, %arg2: memref<128x128xbf16, #tpu.memory_space<vmem>>, %arg3: memref<1x128xf32, #tpu.memory_space<vmem>>, %arg4: memref<128x128xbf16, #tpu.memory_space<vmem>>, %arg5: memref<1x128xf32, #tpu.memory_space<vmem>>, %arg6: memref<256x128xf32, #tpu.memory_space<vmem>>) attributes {dimension_semantics = [#tpu.dimension_semantics<parallel>], iteration_bounds = array<i64: 1>, scalar_prefetch = 0 : i64, scratch_operands = 0 : i64, tpu.core_type = #tpu.core_type<tc>, window_params = [{transform_indices = @transform_0, window_bounds = array<i64: 256, 128>}, {pipeline_mode = #tpu.pipeline_mode<synchronous>, transform_indices = @transform_1, window_bounds = array<i64: 128, 128>}, {pipeline_mode = #tpu.pipeline_mode<synchronous>, transform_indices = @transform_2, window_bounds = array<i64: 1, 128>}, {pipeline_mode = #tpu.pipeline_mode<synchronous>, transform_indices = @transform_3, window_bounds = array<i64: 128, 128>}, {pipeline_mode = #tpu.pipeline_mode<synchronous>, transform_indices = @transform_4, window_bounds = array<i64: 1, 128>}, {transform_indices = @transform_5, window_bounds = array<i64: 256, 128>}]} {
    %c0 = arith.constant 0 : index
    %c0_0 = arith.constant 0 : index
    %0 = vector.load %arg1[%c0, %c0_0] : memref<256x128xbf16, #tpu.memory_space<vmem>>, vector<256x128xbf16>
    %c0_1 = arith.constant 0 : index
    %c0_2 = arith.constant 0 : index
    %1 = vector.load %arg2[%c0_1, %c0_2] : memref<128x128xbf16, #tpu.memory_space<vmem>>, vector<128x128xbf16>
    %cst = arith.constant dense<0.000000e+00> : vector<256x128xf32>
    %2 = tpu.matmul %0, %1, %cst {dimension_numbers = #tpu.dot_dimension_numbers<[1], [0], [0], [1], [0, 0, 1, 1], [], []>} : vector<256x128xbf16>, vector<128x128xbf16>, vector<256x128xf32> -> vector<256x128xf32>
    %c0_3 = arith.constant 0 : index
    %c0_4 = arith.constant 0 : index
    %3 = vector.load %arg3[%c0_3, %c0_4] : memref<1x128xf32, #tpu.memory_space<vmem>>, vector<1x128xf32>
    %4 = vector.broadcast %3 : vector<1x128xf32> to vector<256x128xf32>
    %5 = arith.addf %2, %4 : vector<256x128xf32>
    %6 = arith.mulf %5, %5 : vector<256x128xf32>
    %cst_5 = arith.constant 0.0356774069 : f32
    %7 = vector.broadcast %cst_5 : f32 to vector<256x128xf32>
    %8 = arith.mulf %7, %6 : vector<256x128xf32>
    %cst_6 = arith.constant 0.797884583 : f32
    %9 = vector.broadcast %cst_6 : f32 to vector<256x128xf32>
    %10 = arith.addf %9, %8 : vector<256x128xf32>
    %11 = arith.mulf %5, %10 : vector<256x128xf32>
    %12 = math.tanh %11 : vector<256x128xf32>
    %cst_7 = arith.constant 5.000000e-01 : f32
    %13 = vector.broadcast %cst_7 : f32 to vector<256x128xf32>
    %14 = arith.mulf %13, %12 : vector<256x128xf32>
    %cst_8 = arith.constant 5.000000e-01 : f32
    %15 = vector.broadcast %cst_8 : f32 to vector<256x128xf32>
    %16 = arith.addf %15, %14 : vector<256x128xf32>
    %17 = arith.mulf %5, %16 : vector<256x128xf32>
    %18 = arith.truncf %17 : vector<256x128xf32> to vector<256x128xbf16>
    %c0_9 = arith.constant 0 : index
    %c0_10 = arith.constant 0 : index
    %19 = vector.load %arg4[%c0_9, %c0_10] : memref<128x128xbf16, #tpu.memory_space<vmem>>, vector<128x128xbf16>
    %cst_11 = arith.constant dense<0.000000e+00> : vector<256x128xf32>
    %20 = tpu.matmul %18, %19, %cst_11 {dimension_numbers = #tpu.dot_dimension_numbers<[1], [0], [0], [1], [0, 0, 1, 1], [], []>} : vector<256x128xbf16>, vector<128x128xbf16>, vector<256x128xf32> -> vector<256x128xf32>
    %c0_12 = arith.constant 0 : index
    %c0_13 = arith.constant 0 : index
    %21 = vector.load %arg5[%c0_12, %c0_13] : memref<1x128xf32, #tpu.memory_space<vmem>>, vector<1x128xf32>
    %22 = vector.broadcast %21 : vector<1x128xf32> to vector<256x128xf32>
    %23 = arith.addf %20, %22 : vector<256x128xf32>
    %c0_14 = arith.constant 0 : index
    %c0_15 = arith.constant 0 : index
    %24 = vector.load %arg6[%c0_14, %c0_15] : memref<256x128xf32, #tpu.memory_space<vmem>>, vector<256x128xf32>
    tpu.vector_store %arg6[%c0_14, %c0_15], %23 {strides = array<i32>} : memref<256x128xf32, #tpu.memory_space<vmem>>, vector<256x128xf32>,
    return
  }
  func.func @transform_0(%arg0: i32) -> (i32, i32) {
    %c0_i32 = arith.constant 0 : i32
    %c0_i32_0 = arith.constant 0 : i32
    return %arg0, %c0_i32 : i32, i32
  }
  func.func @transform_1(%arg0: i32) -> (i32, i32) {
    %c0_i32 = arith.constant 0 : i32
    %c0_i32_0 = arith.constant 0 : i32
    %c0_i32_1 = arith.constant 0 : i32
    return %c0_i32, %c0_i32_0 : i32, i32
  }
  func.func @transform_2(%arg0: i32) -> (i32, i32) {
    %c0_i32 = arith.constant 0 : i32
    %c0_i32_0 = arith.constant 0 : i32
    %c0_i32_1 = arith.constant 0 : i32
    return %c0_i32, %c0_i32_0 : i32, i32
  }
  func.func @transform_3(%arg0: i32) -> (i32, i32) {
    %c0_i32 = arith.constant 0 : i32
    %c0_i32_0 = arith.constant 0 : i32
    %c0_i32_1 = arith.constant 0 : i32
    return %c0_i32, %c0_i32_0 : i32, i32
  }
  func.func @transform_4(%arg0: i32) -> (i32, i32) {
    %c0_i32 = arith.constant 0 : i32
    %c0_i32_0 = arith.constant 0 : i32
    %c0_i32_1 = arith.constant 0 : i32
    return %c0_i32, %c0_i32_0 : i32, i32
  }
  func.func @transform_5(%arg0: i32) -> (i32, i32) {
    %c0_i32 = arith.constant 0 : i32
    %c0_i32_0 = arith.constant 0 : i32
    return %arg0, %c0_i32 : i32, i32
  }
}

</mosaic_0001>

<bundles_post_ra>
// kernel: tpu_custom_call.1
= control target key start
LH: loop header
LB: loop body
LE: loop exit
PB: predicated region body
PF: predicated region fallthrough
CT: control target
= control target key end

     0   :  { %10 = vsyncpa [#allocation3], 0  ;;  %s1736_s0 = inlined_call_operand.hbm [shape: bf16[256,128], index: 0, kind: input, shape index: {}]   ;;  %s1737_s1 = inlined_call_operand.hbm [shape: bf16[128,128], index: 1, kind: input, shape index: {}]   ;;  %s1738_s2 = inlined_call_operand.vmem [shape: f32[1,128], index: 2, kind: input, shape index: {}]   ;;  %s1739_s3 = inlined_call_operand.hbm [shape: bf16[128,128], index: 3, kind: input, shape index: {}]   ;;  %s1740_s4 = inlined_call_operand.vmem [shape: f32[1,128], index: 4, kind: input, shape index: {}]   ;;  %s1741_s5 = inlined_call_operand.hbm [shape: f32[256,128], index: 5, kind: output, shape index: {}]  }
   0x1   :  { %11 = vsyncpa [#allocation6], 0 }
   0x2   :  { %12 = vsyncpa [#allocation4], 0  ;;  %s1353_s18 = smov [#allocation5]   ;;  %s1354_s20 = smov [#allocation2]  }
   0x3   :  { %s30_s19 = sshll.u32 %s1353_s18, 4  ;;  %s18_s21 = sshll.u32 %s1354_s20, 4  ;;  %s31_s19 = int_to_ptr.vmem [resolvable:$true] %s30_s19  ;;  %s1391_s21 = int_to_ptr.vmem [resolvable:$true] %s18_s21 }
   0x4   :  { %s1259_s24 = scalar_lea.hbm %s1737_s1, 1024 }
   0x5   :  { %p1260_p0 = scmp.ne.s32.totalorder %s1737_s1, %s1259_s24  ;;  %p1263_p1 = scmp.lt.u32.totalorder %s1259_s24, %s1737_s1 }
   0x7   :  { %p1265_p2 = pnand %p1263_p1, %p1260_p0 }
   0x9   :  { %1268 = shalt.err (!%p1265_p2)
}
   0xa   :  { %s1269_s29 = scalar_lea.vmem %s31_s19, 1024  ;;  %p1274_p4 = scmp.lt.s32.totalorder %s31_s19, %s31_s19 }
   0xb   :  { %p1270_p3 = scmp.ne.s32.totalorder %s31_s19, %s1269_s29  ;;  %p1275_p5 = scmp.lt.s32.totalorder %s1269_s29, %s1269_s29 }
   0xd   :  { %p1276_p6 = por %p1275_p5, %p1274_p4 }
   0xf   :  { %p1277_p7 = pnand %p1276_p6, %p1270_p3 }
  0x11   :  { %1280 = shalt.err (!%p1277_p7)
}
  0x12   :  { %s1355_s30 = smov 64   ;;  %s1356_s6 = smov 4  }
  0x13   :  { %36 = dma.hbm_to_vmem [thread:$0]  %s1737_s1, 1024, %s31_s19, [#allocation6], %s1355_s30, %s1355_s30, %s1356_s6  }
  0x14   :  { %s1281_s11 = scalar_lea.hbm %s1736_s0, 2048 }
  0x15   :  { %p1282_p8 = scmp.ne.s32.totalorder %s1736_s0, %s1281_s11  ;;  %p1285_p9 = scmp.lt.u32.totalorder %s1281_s11, %s1736_s0 }
  0x17   :  { %p1287_p10 = pnand %p1285_p9, %p1282_p8 }
  0x19   :  { %1290 = shalt.err (!%p1287_p10)
}
  0x1a   :  { %s1291_s16 = scalar_lea.vmem %s1391_s21, 2048  ;;  %p1296_p12 = scmp.lt.s32.totalorder %s1391_s21, %s1391_s21 }
  0x1b   :  { %p1292_p11 = scmp.ne.s32.totalorder %s1391_s21, %s1291_s16  ;;  %p1297_p13 = scmp.lt.s32.totalorder %s1291_s16, %s1291_s16 }
  0x1d   :  { %p1298_p0 = por %p1297_p13, %p1296_p12 }
  0x1f   :  { %p1299_p1 = pnand %p1298_p0, %p1292_p11 }
  0x21   :  { %1302 = shalt.err (!%p1299_p1)
}
  0x22   :  { %24 = dma.hbm_to_vmem [thread:$0]  %s1736_s0, 2048, %s1391_s21, [#allocation3], %s1355_s30, %s1355_s30, %s1356_s6  }
  0x23   :  { %s1357_s18 = smov [#allocation7]   ;;  %s1303_s23 = scalar_lea.hbm %s1739_s3, 1024 }
  0x24   :  { %s44_s19 = sshll.u32 %s1357_s18, 4  ;;  %p1304_p2 = scmp.ne.s32.totalorder %s1739_s3, %s1303_s23  ;;  %s45_s19 = int_to_ptr.vmem [resolvable:$true] %s44_s19 }
  0x25   :  { %p1307_p3 = scmp.lt.u32.totalorder %s1303_s23, %s1739_s3 }
  0x27   :  { %p1309_p4 = pnand %p1307_p3, %p1304_p2 }
  0x29   :  { %1312 = shalt.err (!%p1309_p4)
}
  0x2a   :  { %s1313_s28 = scalar_lea.vmem %s45_s19, 1024  ;;  %p1318_p6 = scmp.lt.s32.totalorder %s45_s19, %s45_s19 }
  0x2b   :  { %p1314_p5 = scmp.ne.s32.totalorder %s45_s19, %s1313_s28  ;;  %p1319_p7 = scmp.lt.s32.totalorder %s1313_s28, %s1313_s28 }
  0x2d   :  { %p1320_p8 = por %p1319_p7, %p1318_p6 }
  0x2f   :  { %p1321_p9 = pnand %p1320_p8, %p1314_p5 }
  0x31   :  { %1324 = shalt.err (!%p1321_p9)
}
  0x32   :  { %50 = dma.hbm_to_vmem [thread:$0]  %s1739_s3, 1024, %s45_s19, [#allocation6], %s1355_s30, %s1355_s30, %s1356_s6  }
  0x33   :  { %1347 = dma.done.wait [#allocation3], 2048  }
  0x34   :  { %1348 = vsyncadd [#allocation3], 4294965248 }
  0x35   :  { %1349 = dma.done.wait [#allocation6], 2048  }
  0x36   :  { %1350 = vsyncadd [#allocation6], 4294965248  ;;  %v1163_v0 = vld [vmem:[#allocation5] sm:$0xff]   ;;  %v1164_v1 = vld [vmem:[#allocation5 + $0x8] sm:$0xff]  }
  0x37   :  { %1059 = vmatprep.subr.bf16.mxu0 %v1163_v0  ;;  %v1165_v2 = vld [vmem:[#allocation5 + $0x10] sm:$0xff]   ;;  %v1166_v3 = vld [vmem:[#allocation5 + $0x18] sm:$0xff]   ;;  %v1171_v4 = vld [vmem:[#allocation2] sm:$0xff]  }
  0x38   :  { %1060 = vmatpush3.bf16.msra.mxu0 %v1163_v0  ;;  %1075 = vmatprep.mubr.bf16.mxu0 %v1171_v4  ;;  %v1167_v5 = vld [vmem:[#allocation5 + $0x20] sm:$0xff]   ;;  %v1168_v6 = vld [vmem:[#allocation5 + $0x28] sm:$0xff]   ;;  %v1169_v7 = vld [vmem:[#allocation5 + $0x30] sm:$0xff]  }
  0x39   :  { %1061 = vmatprep.subr.bf16.mxu0 %v1164_v1  ;;  %v1170_v8 = vld [vmem:[#allocation5 + $0x38] sm:$0xff]   ;;  %v1172_v9 = vld [vmem:[#allocation2 + $0x8] sm:$0xff]   ;;  %v1173_v10 = vld [vmem:[#allocation2 + $0x10] sm:$0xff]  }
  0x3a   :  { %v1174_v11 = vld [vmem:[#allocation2 + $0x18] sm:$0xff]   ;;  %v1175_v12 = vld [vmem:[#allocation2 + $0x20] sm:$0xff]   ;;  %v1176_v13 = vld [vmem:[#allocation2 + $0x28] sm:$0xff]  }
  0x3b   :  { %v1177_v14 = vld [vmem:[#allocation2 + $0x30] sm:$0xff]   ;;  %v1178_v15 = vld [vmem:[#allocation2 + $0x38] sm:$0xff]   ;;  %v1179_v16 = vld [vmem:[#allocation2 + $0x40] sm:$0xff]  }
  0x3c   :  { %1062 = vmatpush3.bf16.msra.mxu0 %v1164_v1  ;;  %v1180_v17 = vld [vmem:[#allocation2 + $0x48] sm:$0xff]   ;;  %v1181_v18 = vld [vmem:[#allocation2 + $0x50] sm:$0xff]   ;;  %v1182_v19 = vld [vmem:[#allocation2 + $0x58] sm:$0xff]  }
  0x3d   :  { %1063 = vmatprep.subr.bf16.mxu0 %v1165_v2  ;;  %v1183_v20 = vld [vmem:[#allocation2 + $0x60] sm:$0xff]   ;;  %v1184_v21 = vld [vmem:[#allocation2 + $0x68] sm:$0xff]   ;;  %v1185_v22 = vld [vmem:[#allocation2 + $0x70] sm:$0xff]  }
  0x3e   :  { %v1186_v23 = vld [vmem:[#allocation2 + $0x78] sm:$0xff]   ;;  %v1187_v24 = vld [vmem:[#allocation7] sm:$0xff]   ;;  %v1188_v25 = vld [vmem:[#allocation7 + $0x8] sm:$0xff]  }
  0x3f   :  { %1107 = vmatprep.subr.bf16.mxu1 %v1187_v24  ;;  %v1189_v26 = vld [vmem:[#allocation7 + $0x10] sm:$0xff]   ;;  %v1190_v27 = vld [vmem:[#allocation7 + $0x18] sm:$0xff]   ;;  %v1191_v28 = vld [vmem:[#allocation7 + $0x20] sm:$0xff]  }
  0x40   :  { %1064 = vmatpush3.bf16.msra.mxu0 %v1165_v2  ;;  %1108 = vmatpush3.bf16.msra.mxu1 %v1187_v24  ;;  %v1192_v29 = vld [vmem:[#allocation7 + $0x28] sm:$0xff]   ;;  %v1193_v30 = vld [vmem:[#allocation7 + $0x30] sm:$0xff]   ;;  %v1194_v31 = vld [vmem:[#allocation7 + $0x38] sm:$0xff]  }
  0x41   :  { %1065 = vmatprep.subr.bf16.mxu0 %v1166_v3  ;;  %1109 = vmatprep.subr.bf16.mxu1 %v1188_v25  ;;  %v1446_v32 = vld [vmem:[%s1738_s2] ss:$0 sm:$0xff] }
  0x44   :  { %1066 = vmatpush3.bf16.msra.mxu0 %v1166_v3  ;;  %1110 = vmatpush3.bf16.msra.mxu1 %v1188_v25 }
  0x45   :  { %1067 = vmatprep.subr.bf16.mxu0 %v1167_v5  ;;  %1111 = vmatprep.subr.bf16.mxu1 %v1189_v26 }
  0x48   :  { %1068 = vmatpush3.bf16.msra.mxu0 %v1167_v5  ;;  %1112 = vmatpush3.bf16.msra.mxu1 %v1189_v26 }
  0x49   :  { %1069 = vmatprep.subr.bf16.mxu0 %v1168_v6  ;;  %1113 = vmatprep.subr.bf16.mxu1 %v1190_v27 }
  0x4c   :  { %1070 = vmatpush3.bf16.msra.mxu0 %v1168_v6  ;;  %1114 = vmatpush3.bf16.msra.mxu1 %v1190_v27 }
  0x4d   :  { %1071 = vmatprep.subr.bf16.mxu0 %v1169_v7  ;;  %1115 = vmatprep.subr.bf16.mxu1 %v1191_v28 }
  0x50   :  { %1072 = vmatpush3.bf16.msra.mxu0 %v1169_v7  ;;  %1116 = vmatpush3.bf16.msra.mxu1 %v1191_v28 }
  0x51   :  { %1073 = vmatprep.subr.bf16.mxu0 %v1170_v8  ;;  %1117 = vmatprep.subr.bf16.mxu1 %v1192_v29 }
  0x54   :  { %1074 = vmatpush3.bf16.msra.mxu0 %v1170_v8  ;;  %1118 = vmatpush3.bf16.msra.mxu1 %v1192_v29 }
  0x55   :  { %1119 = vmatprep.subr.bf16.mxu1 %v1193_v30 }
  0x57   :  { %1076 = vmatmul.mubr.bf16.vlgmr.msra.gmra.mrb[0].mxu0 %v1172_v9 }
  0x58   :  { %1079 = vmatprep.mubr.bf16.mxu0 %v1173_v10  ;;  %1120 = vmatpush3.bf16.msra.mxu1 %v1193_v30 }
  0x59   :  { %1121 = vmatprep.subr.bf16.mxu1 %v1194_v31 }
  0x5c   :  { %1122 = vmatpush3.bf16.msra.mxu1 %v1194_v31 }
  0x5f   :  { %1080 = vmatmul.mubr.bf16.gmra.mrb[4].mxu0 %v1174_v11 }
  0x60   :  { %1083 = vmatprep.mubr.bf16.mxu0 %v1175_v12 }
  0x67   :  { %1084 = vmatmul.mubr.bf16.gmra.mrb[8].mxu0 %v1176_v13 }
  0x68   :  { %1087 = vmatprep.mubr.bf16.mxu0 %v1177_v14 }
  0x6f   :  { %1088 = vmatmul.mubr.bf16.gmra.mrb[12].mxu0 %v1178_v15 }
  0x70   :  { %1091 = vmatprep.mubr.bf16.mxu0 %v1179_v16 }
  0x77   :  { %1092 = vmatmul.mubr.bf16.gmra.mrb[16].mxu0 %v1180_v17 }
  0x78   :  { %1095 = vmatprep.mubr.bf16.mxu0 %v1181_v18 }
  0x7f   :  { %1096 = vmatmul.mubr.bf16.gmra.mrb[20].mxu0 %v1182_v19 }
  0x80   :  { %1099 = vmatprep.mubr.bf16.mxu0 %v1183_v20 }
  0x87   :  { %1100 = vmatmul.mubr.bf16.gmra.mrb[24].mxu0 %v1184_v21 }
  0x88   :  { %1103 = vmatprep.mubr.bf16.mxu0 %v1185_v22 }
  0x8f   :  { %1104 = vmatmul.mubr.bf16.gmra.mrb[28].mxu0 %v1186_v23 }
 0x12a   :  { %v1077_v33 = vpop.f32.mrb[0].mxu0 }
 0x12b   :  { %v1449_v34 = vadd.f32 %v1077_v33, %v1446_v32  ;;  %v296_v35 = vpop.f32.mrb[1].mxu0 }
 0x12c   :  { %v1452_v36 = vadd.f32 %v1446_v32, %v296_v35  ;;  %v1078_v37 = vpop.f32.mrb[2].mxu0 }
 0x12d   :  { %v425_v38 = vmul.f32 %v1449_v34, %v1449_v34  ;;  %v1457_v39 = vadd.f32 %v1078_v37, %v1446_v32  ;;  %v299_v40 = vpop.f32.mrb[3].mxu0 }
 0x12e   :  { %v423_v41 = vmul.f32 %v1452_v36, %v1452_v36  ;;  %v1462_v42 = vadd.f32 %v1446_v32, %v299_v40 }
 0x12f   :  { %v457_v43 = vmul.f32 0.035677407, %v425_v38  ;;  %v426_v44 = vmul.f32 %v1457_v39, %v1457_v39 }
 0x130   :  { %v455_v45 = vmul.f32 0.035677407, %v423_v41  ;;  %v424_v46 = vmul.f32 %v1462_v42, %v1462_v42 }
 0x131   :  { %v489_v47 = vadd.f32 0.7978846, %v457_v43  ;;  %v458_v48 = vmul.f32 0.035677407, %v426_v44 }
 0x132   :  { %v487_v49 = vadd.f32 0.7978846, %v455_v45  ;;  %v456_v50 = vmul.f32 0.035677407, %v424_v46  ;;  %v1081_v51 = vpop.f32.mrb[4].mxu0 }
 0x133   :  { %v521_v52 = vmul.f32 %v489_v47, %v1449_v34  ;;  %v490_v53 = vadd.f32 0.7978846, %v458_v48  ;;  %v1470_v54 = vadd.f32 %v1081_v51, %v1446_v32  ;;  %v312_v55 = vpop.f32.mrb[5].mxu0 }
 0x134   :  { %v519_v56 = vmul.f32 %v487_v49, %v1452_v36  ;;  %v488_v57 = vadd.f32 0.7978846, %v456_v50  ;;  %v1474_v58 = vadd.f32 %v1446_v32, %v312_v55  ;;  %v1082_v59 = vpop.f32.mrb[6].mxu0 }
 0x135   :  { %1195 = vtanh.f32 %v521_v52  ;;  %v522_v60 = vmul.f32 %v490_v53, %v1457_v39  ;;  %v429_v61 = vmul.f32 %v1470_v54, %v1470_v54  ;;  %v1480_v62 = vadd.f32 %v1082_v59, %v1446_v32  ;;  %v315_v63 = vpop.f32.mrb[7].mxu0 }
 0x136   :  { %1197 = vtanh.f32 %v519_v56  ;;  %v520_v0 = vmul.f32 %v488_v57, %v1462_v42  ;;  %v427_v1 = vmul.f32 %v1474_v58, %v1474_v58  ;;  %v1486_v2 = vadd.f32 %v1446_v32, %v315_v63 }
 0x137   :  { %1199 = vtanh.f32 %v522_v60  ;;  %v461_v3 = vmul.f32 0.035677407, %v429_v61  ;;  %v430_v4 = vmul.f32 %v1480_v62, %v1480_v62 }
 0x138   :  { %1201 = vtanh.f32 %v520_v0  ;;  %v459_v5 = vmul.f32 0.035677407, %v427_v1  ;;  %v428_v6 = vmul.f32 %v1486_v2, %v1486_v2 }
 0x139   :  { %v493_v7 = vadd.f32 0.7978846, %v461_v3  ;;  %v462_v8 = vmul.f32 0.035677407, %v430_v4 }
 0x13a   :  { %v491_v9 = vadd.f32 0.7978846, %v459_v5  ;;  %v460_v10 = vmul.f32 0.035677407, %v428_v6  ;;  %v1085_v11 = vpop.f32.mrb[8].mxu0 }
 0x13b   :  { %v525_v12 = vmul.f32 %v493_v7, %v1470_v54  ;;  %v494_v13 = vadd.f32 0.7978846, %v462_v8  ;;  %v1494_v14 = vadd.f32 %v1085_v11, %v1446_v32  ;;  %v328_v15 = vpop.f32.mrb[9].mxu0 }
 0x13c   :  { %v523_v16 = vmul.f32 %v491_v9, %v1474_v58  ;;  %v492_v17 = vadd.f32 0.7978846, %v460_v10  ;;  %v1498_v18 = vadd.f32 %v1446_v32, %v328_v15  ;;  %v1086_v19 = vpop.f32.mrb[10].mxu0 }
 0x13d   :  { %1203 = vtanh.f32 %v525_v12  ;;  %v526_v20 = vmul.f32 %v494_v13, %v1480_v62  ;;  %v433_v21 = vmul.f32 %v1494_v14, %v1494_v14  ;;  %v1504_v22 = vadd.f32 %v1086_v19, %v1446_v32  ;;  %v331_v23 = vpop.f32.mrb[11].mxu0 }
 0x13e   :  { %1205 = vtanh.f32 %v523_v16  ;;  %v524_v24 = vmul.f32 %v492_v17, %v1486_v2  ;;  %v431_v25 = vmul.f32 %v1498_v18, %v1498_v18  ;;  %v1510_v26 = vadd.f32 %v1446_v32, %v331_v23 }
 0x13f   :  { %v1196_v27 = vpop.eup %1195  ;;  %1207 = vtanh.f32 %v526_v20  ;;  %v465_v28 = vmul.f32 0.035677407, %v433_v21  ;;  %v434_v29 = vmul.f32 %v1504_v22, %v1504_v22 }
 0x140   :  { %v1198_v30 = vpop.eup %1197  ;;  %v585_v31 = vmul.f32 0.5, %v1196_v27  ;;  %1209 = vtanh.f32 %v524_v24  ;;  %v463_v33 = vmul.f32 0.035677407, %v431_v25  ;;  %v432_v35 = vmul.f32 %v1510_v26, %v1510_v26 }
 0x141   :  { %v1200_v37 = vpop.eup %1199  ;;  %v497_v38 = vadd.f32 0.7978846, %v465_v28  ;;  %v466_v40 = vmul.f32 0.035677407, %v434_v29  ;;  %v583_v45 = vmul.f32 0.5, %v1198_v30 }
 0x142   :  { %v1202_v41 = vpop.eup %1201  ;;  %v495_v43 = vadd.f32 0.7978846, %v463_v33  ;;  %v464_v44 = vmul.f32 0.035677407, %v432_v35  ;;  %v617_v46 = vadd.f32 0.5, %v585_v31  ;;  %v1089_v49 = vpop.f32.mrb[12].mxu0 }
 0x143   :  { %v529_v47 = vmul.f32 %v497_v38, %v1494_v14  ;;  %v498_v48 = vadd.f32 0.7978846, %v466_v40  ;;  %v586_v50 = vmul.f32 0.5, %v1200_v37  ;;  %v344_v53 = vpop.f32.mrb[13].mxu0  ;;  %v584_v55 = vmul.f32 0.5, %v1202_v41 }
 0x144   :  { %v527_v51 = vmul.f32 %v495_v43, %v1498_v18  ;;  %v496_v52 = vadd.f32 0.7978846, %v464_v44  ;;  %v1520_v57 = vadd.f32 %v1089_v49, %v1446_v32  ;;  %v1523_v59 = vadd.f32 %v1446_v32, %v344_v53  ;;  %v1090_v60 = vpop.f32.mrb[14].mxu0 }
 0x145   :  { %1211 = vtanh.f32 %v529_v47  ;;  %v530_v56 = vmul.f32 %v498_v48, %v1504_v22  ;;  %v1527_v63 = vadd.f32 %v1090_v60, %v1446_v32  ;;  %v347_v0 = vpop.f32.mrb[15].mxu0  ;;  %v615_v1 = vadd.f32 0.5, %v583_v45 }
 0x146   :  { %1213 = vtanh.f32 %v527_v51  ;;  %v528_v61 = vmul.f32 %v496_v52, %v1510_v26  ;;  %v437_v4 = vmul.f32 %v1520_v57, %v1520_v57  ;;  %v435_v5 = vmul.f32 %v1523_v59, %v1523_v59 }
 0x147   :  { %v1204_v3 = vpop.eup %1203  ;;  %1215 = vtanh.f32 %v530_v56  ;;  %v1534_v6 = vadd.f32 %v1446_v32, %v347_v0  ;;  %v618_v8 = vadd.f32 0.5, %v586_v50  ;;  %v438_v10 = vmul.f32 %v1527_v63, %v1527_v63 }
 0x148   :  { %v1206_v7 = vpop.eup %1205  ;;  %v589_v9 = vmul.f32 0.5, %v1204_v3  ;;  %1217 = vtanh.f32 %v528_v61  ;;  %v469_v13 = vmul.f32 0.035677407, %v437_v4  ;;  %v467_v15 = vmul.f32 0.035677407, %v435_v5 }
 0x149   :  { %v1208_v11 = vpop.eup %1207  ;;  %v587_v12 = vmul.f32 0.5, %v1206_v7  ;;  %v436_v16 = vmul.f32 %v1534_v6, %v1534_v6  ;;  %v1541_v19 = vmul.f32 %v617_v46, %v1449_v34  ;;  %v470_v23 = vmul.f32 0.035677407, %v438_v10 }
 0x14a   :  { %v1210_v17 = vpop.eup %1209  ;;  %v621_v20 = vadd.f32 0.5, %v589_v9  ;;  %v590_v21 = vmul.f32 0.5, %v1208_v11  ;;  %v1093_v24 = vpop.f32.mrb[16].mxu0  ;;  %v501_v27 = vadd.f32 0.7978846, %v469_v13  ;;  %v616_v29 = vadd.f32 0.5, %v584_v55 }
 0x14b   :  { %v588_v25 = vmul.f32 0.5, %v1210_v17  ;;  %v499_v28 = vadd.f32 0.7978846, %v467_v15  ;;  %v650_v30 = vmul.f32 %v618_v8, %v1457_v39  ;;  %v502_v31 = vadd.f32 0.7978846, %v470_v23  ;;  %v360_v35 = vpop.f32.mrb[17].mxu0 }
 0x14c   :  { %v468_v33 = vmul.f32 0.035677407, %v436_v16  ;;  %v647_v37 = vmul.f32 %v615_v1, %v1452_v36  ;;  %v1546_v38 = vmul.f32 %v621_v20, %v1470_v54  ;;  %v619_v34 = vadd.f32 0.5, %v587_v12  ;;  %v1094_v43 = vpop.f32.mrb[18].mxu0 }
 0x14d   :  { %v533_v40 = vmul.f32 %v501_v27, %v1520_v57  ;;  %v531_v41 = vmul.f32 %v499_v28, %v1523_v59  ;;  %v622_v44 = vadd.f32 0.5, %v590_v21  ;;  %v534_v45 = vmul.f32 %v502_v31, %v1527_v63  ;;  %v363_v47 = vpop.f32.mrb[19].mxu0 }
 0x14e   :  { %v500_v46 = vadd.f32 0.7978846, %v468_v33  ;;  %v1552_v39 = vadd.f32 %v1093_v24, %v1446_v32  ;;  %v620_v49 = vadd.f32 0.5, %v588_v25  ;;  %v1555_v36 = vadd.f32 %v1446_v32, %v360_v35 }
 0x14f   :  { %v1212_v48 = vpop.eup %1211  ;;  %1219 = vtanh.f32 %v533_v40  ;;  %v648_v54 = vmul.f32 %v616_v29, %v1462_v42  ;;  %v651_v5 = vmul.f32 %v619_v34, %v1474_v58  ;;  %v1565_v9 = vadd.f32 %v1094_v43, %v1446_v32 }
 0x150   :  { %v1214_v50 = vpop.eup %1213  ;;  %v593_v51 = vmul.f32 0.5, %v1212_v48  ;;  %1221 = vtanh.f32 %v531_v41  ;;  %v532_v52 = vmul.f32 %v500_v46, %v1534_v6  ;;  %v441_v53 = vmul.f32 %v1552_v39, %v1552_v39 }
 0x151   :  { %v1216_v55 = vpop.eup %1215  ;;  %v591_v56 = vmul.f32 0.5, %v1214_v50  ;;  %1223 = vtanh.f32 %v534_v45  ;;  %v439_v60 = vmul.f32 %v1555_v36, %v1555_v36  ;;  %v679_v61 = vpack.c.bf16 %v648_v54, %v647_v37 }
 0x152   :  { %v1218_v0 = vpop.eup %1217  ;;  %v625_v1 = vadd.f32 0.5, %v593_v51  ;;  %v594_v3 = vmul.f32 0.5, %v1216_v55  ;;  %1225 = vtanh.f32 %v532_v52  ;;  %v473_v42 = vmul.f32 0.035677407, %v441_v53  ;;  %v1097_v4 = vpop.f32.mrb[20].mxu0 }
 0x153   :  { %v592_v7 = vmul.f32 0.5, %v1218_v0  ;;  %v471_v8 = vmul.f32 0.035677407, %v439_v60  ;;  %1123 = vmatprep.mubr.bf16.mxu1 %v679_v61  ;;  %v376_v10 = vpop.f32.mrb[21].mxu0  ;;  %v654_v11 = vmul.f32 %v622_v44, %v1480_v62  ;;  %v652_v12 = vmul.f32 %v620_v49, %v1486_v2 }
 0x154   :  { %v505_v13 = vadd.f32 0.7978846, %v473_v42  ;;  %v680_v15 = vpack.c.bf16 %v650_v30, %v1541_v19  ;;  %v1098_v16 = vpop.f32.mrb[22].mxu0  ;;  %v1571_v17 = vmul.f32 %v625_v1, %v1494_v14  ;;  %v623_v20 = vadd.f32 0.5, %v591_v56 }
 0x155   :  { %v503_v58 = vadd.f32 0.7978846, %v471_v8  ;;  %v442_v21 = vmul.f32 %v1565_v9, %v1565_v9  ;;  %v379_v23 = vpop.f32.mrb[23].mxu0  ;;  %v626_v24 = vadd.f32 0.5, %v594_v3  ;;  %v1577_v62 = vadd.f32 %v1446_v32, %v363_v47 }
 0x156   :  { %v537_v25 = vmul.f32 %v505_v13, %v1552_v39  ;;  %1124 = vmatmul.mubr.bf16.vlgmr.msra.gmra.mrb[0].mxu1 %v680_v15  ;;  %v1580_v2 = vadd.f32 %v1097_v4, %v1446_v32  ;;  %v624_v19 = vadd.f32 0.5, %v592_v7  ;;  %v1584_v28 = vadd.f32 %v1446_v32, %v376_v10 }
 0x157   :  { %v535_v14 = vmul.f32 %v503_v58, %v1555_v36  ;;  %v474_v27 = vmul.f32 0.035677407, %v442_v21  ;;  %v440_v29 = vmul.f32 %v1577_v62, %v1577_v62  ;;  %v681_v31 = vpack.c.bf16 %v652_v12, %v651_v5 }
 0x158   :  { %1227 = vtanh.f32 %v537_v25  ;;  %v445_v30 = vmul.f32 %v1580_v2, %v1580_v2  ;;  %v443_v37 = vmul.f32 %v1584_v28, %v1584_v28  ;;  %v1593_v34 = vadd.f32 %v1098_v16, %v1446_v32 }
 0x159   :  { %v1220_v33 = vpop.eup %1219  ;;  %1229 = vtanh.f32 %v535_v14  ;;  %v506_v35 = vadd.f32 0.7978846, %v474_v27  ;;  %v472_v43 = vmul.f32 0.035677407, %v440_v29  ;;  %1127 = vmatprep.mubr.bf16.mxu1 %v681_v31  ;;  %v682_v45 = vpack.c.bf16 %v654_v11, %v1546_v38 }
 0x15a   :  { %v1222_v40 = vpop.eup %1221  ;;  %v597_v41 = vmul.f32 0.5, %v1220_v33  ;;  %v477_v44 = vmul.f32 0.035677407, %v445_v30  ;;  %v1101_v46 = vpop.f32.mrb[24].mxu0  ;;  %v475_v54 = vmul.f32 0.035677407, %v443_v37  ;;  %v446_v50 = vmul.f32 %v1593_v34, %v1593_v34 }
 0x15b   :  { %v1224_v47 = vpop.eup %1223  ;;  %v595_v48 = vmul.f32 0.5, %v1222_v40  ;;  %v538_v49 = vmul.f32 %v506_v35, %v1565_v9  ;;  %v392_v51 = vpop.f32.mrb[25].mxu0  ;;  %v655_v53 = vmul.f32 %v623_v20, %v1498_v18  ;;  %v504_v56 = vadd.f32 0.7978846, %v472_v43 }
 0x15c   :  { %v1226_v52 = vpop.eup %1225  ;;  %v598_v55 = vmul.f32 0.5, %v1224_v47  ;;  %v509_v60 = vadd.f32 0.7978846, %v477_v44  ;;  %v507_v38 = vadd.f32 0.7978846, %v475_v54  ;;  %v1102_v1 = vpop.f32.mrb[26].mxu0  ;;  %v658_v3 = vmul.f32 %v626_v24, %v1504_v22 }
 0x15d   :  { %v627_v61 = vadd.f32 0.5, %v595_v48  ;;  %v596_v0 = vmul.f32 0.5, %v1226_v52  ;;  %1231 = vtanh.f32 %v538_v49  ;;  %v656_v42 = vmul.f32 %v624_v19, %v1510_v26  ;;  %v395_v7 = vpop.f32.mrb[27].mxu0 }
 0x15e   :  { %v536_v4 = vmul.f32 %v504_v56, %v1577_v62  ;;  %v541_v5 = vmul.f32 %v509_v60, %v1580_v2  ;;  %1128 = vmatmul.mubr.bf16.gmra.mrb[4].mxu1 %v682_v45  ;;  %v1604_v8 = vadd.f32 0.5, %v597_v41  ;;  %v630_v18 = vadd.f32 0.5, %v598_v55 }
 0x15f   :  { %v539_v10 = vmul.f32 %v507_v38, %v1584_v28  ;;  %v478_v11 = vmul.f32 0.035677407, %v446_v50  ;;  %v1608_v12 = vmul.f32 %v627_v61, %v1523_v59  ;;  %v1611_v22 = vadd.f32 %v1446_v32, %v379_v23 }
 0x160   :  { %1233 = vtanh.f32 %v536_v4  ;;  %v1614_v26 = vadd.f32 %v1101_v46, %v1446_v32  ;;  %v628_v13 = vadd.f32 0.5, %v596_v0  ;;  %v1617_v16 = vadd.f32 %v1446_v32, %v392_v51 }
 0x161   :  { %1235 = vtanh.f32 %v541_v5  ;;  %v510_v15 = vadd.f32 0.7978846, %v478_v11  ;;  %v444_v58 = vmul.f32 %v1611_v22, %v1611_v22  ;;  %v683_v21 = vpack.c.bf16 %v656_v42, %v655_v53 }
 0x162   :  { %v1228_v20 = vpop.eup %1227  ;;  %1237 = vtanh.f32 %v539_v10  ;;  %v449_v59 = vmul.f32 %v1614_v26, %v1614_v26  ;;  %v1105_v23 = vpop.f32.mrb[28].mxu0  ;;  %v447_v14 = vmul.f32 %v1617_v16, %v1617_v16  ;;  %v1627_v27 = vadd.f32 %v1102_v1, %v1446_v32 }
 0x163   :  { %v1230_v24 = vpop.eup %1229  ;;  %v601_v25 = vmul.f32 0.5, %v1228_v20  ;;  %v542_v19 = vmul.f32 %v510_v15, %v1593_v34  ;;  %v408_v29 = vpop.f32.mrb[29].mxu0  ;;  %v476_v31 = vmul.f32 0.035677407, %v444_v58  ;;  %1131 = vmatprep.mubr.bf16.mxu1 %v683_v21  ;;  %v684_v35 = vpack.c.bf16 %v658_v3, %v1571_v17 }
 0x164   :  { %v599_v30 = vmul.f32 0.5, %v1230_v24  ;;  %v481_v33 = vmul.f32 0.035677407, %v449_v59  ;;  %v1106_v37 = vpop.f32.mrb[30].mxu0  ;;  %v662_v40 = vmul.f32 %v630_v18, %v1527_v63  ;;  %v479_v41 = vmul.f32 0.035677407, %v447_v14 }
 0x165   :  { %1239 = vtanh.f32 %v542_v19  ;;  %v450_v43 = vmul.f32 %v1627_v27, %v1627_v27  ;;  %v411_v44 = vpop.f32.mrb[31].mxu0  ;;  %v660_v45 = vmul.f32 %v628_v13, %v1534_v6  ;;  %v508_v46 = vadd.f32 0.7978846, %v476_v31 }
 0x166   :  { %v513_v47 = vadd.f32 0.7978846, %v481_v33  ;;  %1132 = vmatmul.mubr.bf16.gmra.mrb[8].mxu1 %v684_v35  ;;  %v1635_v48 = vadd.f32 %v1446_v32, %v395_v7  ;;  %v633_v54 = vadd.f32 0.5, %v601_v25  ;;  %v511_v17 = vadd.f32 0.7978846, %v479_v41 }
 0x167   :  { %v1232_v49 = vpop.eup %1231  ;;  %v482_v50 = vmul.f32 0.035677407, %v450_v43  ;;  %v1638_v63 = vadd.f32 %v1105_v23, %v1446_v32  ;;  %v631_v51 = vadd.f32 0.5, %v599_v30  ;;  %v540_v53 = vmul.f32 %v508_v46, %v1611_v22 }
 0x168   :  { %v602_v52 = vmul.f32 0.5, %v1232_v49  ;;  %v545_v55 = vmul.f32 %v513_v47, %v1614_v26  ;;  %v543_v6 = vmul.f32 %v511_v17, %v1617_v16  ;;  %v448_v60 = vmul.f32 %v1635_v48, %v1635_v48 }
 0x169   :  { %v514_v56 = vadd.f32 0.7978846, %v482_v50  ;;  %v453_v61 = vmul.f32 %v1638_v63, %v1638_v63  ;;  %1241 = vtanh.f32 %v540_v53  ;;  %v1648_v1 = vadd.f32 %v1446_v32, %v408_v29 }
 0x16a   :  { %v1234_v0 = vpop.eup %1233  ;;  %v634_v38 = vadd.f32 0.5, %v602_v52  ;;  %v685_v3 = vpack.c.bf16 %v660_v45, %v1608_v12  ;;  %1243 = vtanh.f32 %v545_v55  ;;  %v480_v7 = vmul.f32 0.035677407, %v448_v60 }
 0x16b   :  { %v1236_v42 = vpop.eup %1235  ;;  %v600_v4 = vmul.f32 0.5, %v1234_v0  ;;  %v546_v5 = vmul.f32 %v514_v56, %v1627_v27  ;;  %v661_v10 = vmul.f32 %v1604_v8, %v1520_v57  ;;  %1245 = vtanh.f32 %v543_v6 }
 0x16c   :  { %v1238_v18 = vpop.eup %1237  ;;  %v605_v11 = vmul.f32 0.5, %v1236_v42  ;;  %v485_v13 = vmul.f32 0.035677407, %v453_v61  ;;  %1135 = vmatprep.mubr.bf16.mxu1 %v685_v3  ;;  %v665_v15 = vmul.f32 %v633_v54, %v1552_v39  ;;  %v512_v58 = vadd.f32 0.7978846, %v480_v7 }
 0x16d   :  { %v632_v20 = vadd.f32 0.5, %v600_v4  ;;  %1247 = vtanh.f32 %v546_v5  ;;  %v663_v12 = vmul.f32 %v631_v51, %v1555_v36  ;;  %v451_v21 = vmul.f32 %v1648_v1, %v1648_v1 }
 0x16e   :  { %v517_v59 = vadd.f32 0.7978846, %v485_v13  ;;  %v1659_v23 = vadd.f32 %v1106_v37, %v1446_v32  ;;  %v666_v57 = vmul.f32 %v634_v38, %v1565_v9  ;;  %v544_v25 = vmul.f32 %v512_v58, %v1635_v48 }
 0x16f   :  { %v1240_v24 = vpop.eup %1239  ;;  %v664_v8 = vmul.f32 %v632_v20, %v1577_v62  ;;  %v686_v39 = vpack.c.bf16 %v662_v40, %v661_v10  ;;  %v637_v19 = vadd.f32 0.5, %v605_v11  ;;  %v483_v36 = vmul.f32 0.035677407, %v451_v21 }
 0x170   :  { %v606_v14 = vmul.f32 0.5, %v1240_v24  ;;  %v549_v29 = vmul.f32 %v517_v59, %v1638_v63  ;;  %v603_v30 = vmul.f32 0.5, %v1238_v18  ;;  %1249 = vtanh.f32 %v544_v25 }
 0x171   :  { %v454_v31 = vmul.f32 %v1659_v23, %v1659_v23  ;;  %1136 = vmatmul.mubr.bf16.gmra.mrb[12].mxu1 %v686_v39  ;;  %v1668_v33 = vadd.f32 %v1446_v32, %v411_v44  ;;  %v515_v35 = vadd.f32 0.7978846, %v483_v36  ;;  %v687_v62 = vpack.c.bf16 %v664_v8, %v663_v12 }
 0x172   :  { %v638_v9 = vadd.f32 0.5, %v606_v14  ;;  %1251 = vtanh.f32 %v549_v29  ;;  %v688_v41 = vpack.c.bf16 %v666_v57, %v665_v15  ;;  %v669_v45 = vmul.f32 %v637_v19, %v1580_v2 }
 0x173   :  { %v486_v37 = vmul.f32 0.035677407, %v454_v31  ;;  %v452_v40 = vmul.f32 %v1668_v33, %v1668_v33  ;;  %v1242_v43 = vpop.eup %1241  ;;  %v547_v47 = vmul.f32 %v515_v35, %v1648_v1  ;;  %1139 = vmatprep.mubr.bf16.mxu1 %v687_v62  ;;  %v635_v32 = vadd.f32 0.5, %v603_v30  ;;  %v1690_v30 = vld [vmem:[%s1740_s4] ss:$0 sm:$0xff]  ;;  %s1358_s4 = smov [#allocation8]  }
 0x174   :  { %v670_v46 = vmul.f32 %v638_v9, %v1593_v34  ;;  %v1244_v49 = vpop.eup %1243  ;;  %v604_v44 = vmul.f32 0.5, %v1242_v43  ;;  %s964_s6 = sshll.u32 %s1358_s4, 4  ;;  %s965_s6 = int_to_ptr.vmem [resolvable:$true] %s964_s6 }
 0x175   :  { %v518_v54 = vadd.f32 0.7978846, %v486_v37  ;;  %v484_v17 = vmul.f32 0.035677407, %v452_v40  ;;  %v1246_v50 = vpop.eup %1245  ;;  %v609_v51 = vmul.f32 0.5, %v1244_v49  ;;  %1253 = vtanh.f32 %v547_v47  ;;  %s1325_s7 = scalar_lea.vmem %s965_s6, 4096  ;;  %p1330_p11 = scmp.lt.s32.totalorder %s965_s6, %s965_s6 }
 0x176   :  { %v690_v52 = vpack.c.bf16 %v670_v46, %v669_v45  ;;  %v636_v55 = vadd.f32 0.5, %v604_v44  ;;  %v607_v60 = vmul.f32 0.5, %v1246_v50  ;;  %v667_v61 = vmul.f32 %v635_v32, %v1584_v28  ;;  %p1326_p10 = scmp.ne.s32.totalorder %s965_s6, %s1325_s7  ;;  %p1331_p12 = scmp.lt.s32.totalorder %s1325_s7, %s1325_s7 }
 0x177   :  { %v1248_v53 = vpop.eup %1247  ;;  %v550_v6 = vmul.f32 %v518_v54, %v1659_v23  ;;  %v516_v56 = vadd.f32 0.7978846, %v484_v17  ;;  %v641_v2 = vadd.f32 0.5, %v609_v51 }
 0x178   :  { %v610_v34 = vmul.f32 0.5, %v1248_v53  ;;  %v668_v0 = vmul.f32 %v636_v55, %v1611_v22  ;;  %v639_v7 = vadd.f32 0.5, %v607_v60  ;;  %p1332_p13 = por %p1331_p12, %p1330_p11 }
 0x179   :  { %1255 = vtanh.f32 %v550_v6  ;;  %v548_v38 = vmul.f32 %v516_v56, %v1668_v33  ;;  %1140 = vmatmul.mubr.bf16.gmra.mrb[16].mxu1 %v688_v41  ;;  %v673_v5 = vmul.f32 %v641_v2, %v1614_v26 }
 0x17a   :  { %v642_v3 = vadd.f32 0.5, %v610_v34  ;;  %v1250_v42 = vpop.eup %1249  ;;  %v689_v4 = vpack.c.bf16 %v668_v0, %v667_v61  ;;  %v671_v22 = vmul.f32 %v639_v7, %v1617_v16  ;;  %p1333_p0 = pnand %p1332_p13, %p1326_p10 }
 0x17b   :  { %1257 = vtanh.f32 %v548_v38  ;;  %v608_v10 = vmul.f32 0.5, %v1250_v42 }
 0x17c   :  { %v674_v18 = vmul.f32 %v642_v3, %v1627_v27  ;;  %v1252_v11 = vpop.eup %1251  ;;  %1143 = vmatprep.mubr.bf16.mxu1 %v689_v4 }
 0x17d   :  { %v640_v13 = vadd.f32 0.5, %v608_v10  ;;  %v613_v58 = vmul.f32 0.5, %v1252_v11 }
 0x17e   :  { %v692_v28 = vpack.c.bf16 %v674_v18, %v673_v5 }
 0x17f   :  { %v1254_v15 = vpop.eup %1253  ;;  %v672_v20 = vmul.f32 %v640_v13, %v1635_v48  ;;  %v645_v24 = vadd.f32 0.5, %v613_v58 }
 0x180   :  { %v611_v12 = vmul.f32 0.5, %v1254_v15 }
 0x181   :  { %1144 = vmatmul.mubr.bf16.gmra.mrb[20].mxu1 %v690_v52  ;;  %v691_v59 = vpack.c.bf16 %v672_v20, %v671_v22  ;;  %v677_v39 = vmul.f32 %v645_v24, %v1638_v63 }
 0x182   :  { %v643_v27 = vadd.f32 0.5, %v611_v12 }
 0x183   :  { %v1256_v21 = vpop.eup %1255  ;;  %1147 = vmatprep.mubr.bf16.mxu1 %v691_v59 }
 0x184   :  { %v614_v26 = vmul.f32 0.5, %v1256_v21  ;;  %v675_v16 = vmul.f32 %v643_v27, %v1648_v1 }
 0x185   :  { %v1258_v57 = vpop.eup %1257 }
 0x186   :  { %v646_v8 = vadd.f32 0.5, %v614_v26  ;;  %v612_v25 = vmul.f32 0.5, %v1258_v57 }
 0x188   :  { %v678_v19 = vmul.f32 %v646_v8, %v1659_v23  ;;  %v644_v14 = vadd.f32 0.5, %v612_v25 }
 0x189   :  { %1148 = vmatmul.mubr.bf16.gmra.mrb[24].mxu1 %v692_v28 }
 0x18a   :  { %v676_v48 = vmul.f32 %v644_v14, %v1668_v33  ;;  %v694_v29 = vpack.c.bf16 %v678_v19, %v677_v39 }
 0x18c   :  { %v693_v36 = vpack.c.bf16 %v676_v48, %v675_v16 }
 0x18e   :  { %1151 = vmatprep.mubr.bf16.mxu1 %v693_v36 }
 0x191   :  { %1152 = vmatmul.mubr.bf16.gmra.mrb[28].mxu1 %v694_v29 }
 0x229   :  { %v1125_v31 = vpop.f32.mrb[0].mxu1 }
 0x22a   :  { %v809_v63 = vadd.f32 %v1125_v31, %v1690_v30  ;;  %v800_v9 = vpop.f32.mrb[1].mxu1 }
 0x22b   :  { %v801_v23 = vadd.f32 %v1690_v30, %v800_v9  ;;  %v1126_v35 = vpop.f32.mrb[2].mxu1 }
 0x22c   :  { %929 = vst [vmem:[#allocation8 + $0x10] sm:$0xff] %v809_v63  ;;  %v812_v1 = vadd.f32 %v1126_v35, %v1690_v30  ;;  %v803_v33 = vpop.f32.mrb[3].mxu1 }
 0x22d   :  { %927 = vst [vmem:[#allocation8] sm:$0xff] %v801_v23  ;;  %v804_v62 = vadd.f32 %v1690_v30, %v803_v33 }
 0x22e   :  { %930 = vst [vmem:[#allocation8 + $0x18] sm:$0xff] %v812_v1 }
 0x22f   :  { %928 = vst [vmem:[#allocation8 + $0x8] sm:$0xff] %v804_v62 }
 0x231   :  { %v1129_v37 = vpop.f32.mrb[4].mxu1 }
 0x232   :  { %v825_v40 = vadd.f32 %v1129_v37, %v1690_v30  ;;  %v816_v41 = vpop.f32.mrb[5].mxu1 }
 0x233   :  { %v817_v43 = vadd.f32 %v1690_v30, %v816_v41  ;;  %v1130_v45 = vpop.f32.mrb[6].mxu1 }
 0x234   :  { %933 = vst [vmem:[#allocation8 + $0x30] sm:$0xff] %v825_v40  ;;  %v828_v46 = vadd.f32 %v1130_v45, %v1690_v30  ;;  %v819_v47 = vpop.f32.mrb[7].mxu1 }
 0x235   :  { %931 = vst [vmem:[#allocation8 + $0x20] sm:$0xff] %v817_v43  ;;  %v820_v49 = vadd.f32 %v1690_v30, %v819_v47 }
 0x236   :  { %934 = vst [vmem:[#allocation8 + $0x38] sm:$0xff] %v828_v46 }
 0x237   :  { %932 = vst [vmem:[#allocation8 + $0x28] sm:$0xff] %v820_v49 }
 0x239   :  { %v1133_v32 = vpop.f32.mrb[8].mxu1 }
 0x23a   :  { %v841_v44 = vadd.f32 %v1133_v32, %v1690_v30  ;;  %v832_v54 = vpop.f32.mrb[9].mxu1 }
 0x23b   :  { %v833_v17 = vadd.f32 %v1690_v30, %v832_v54  ;;  %v1134_v50 = vpop.f32.mrb[10].mxu1 }
 0x23c   :  { %937 = vst [vmem:[#allocation8 + $0x50] sm:$0xff] %v841_v44  ;;  %v844_v51 = vadd.f32 %v1134_v50, %v1690_v30  ;;  %v835_v52 = vpop.f32.mrb[11].mxu1 }
 0x23d   :  { %935 = vst [vmem:[#allocation8 + $0x40] sm:$0xff] %v833_v17  ;;  %v836_v53 = vadd.f32 %v1690_v30, %v835_v52 }
 0x23e   :  { %938 = vst [vmem:[#allocation8 + $0x58] sm:$0xff] %v844_v51 }
 0x23f   :  { %936 = vst [vmem:[#allocation8 + $0x48] sm:$0xff] %v836_v53 }
 0x244   :  { %v1137_v55 = vpop.f32.mrb[12].mxu1 }
 0x245   :  { %v857_v6 = vadd.f32 %v1137_v55, %v1690_v30  ;;  %v848_v56 = vpop.f32.mrb[13].mxu1 }
 0x246   :  { %v849_v2 = vadd.f32 %v1690_v30, %v848_v56  ;;  %v1138_v60 = vpop.f32.mrb[14].mxu1 }
 0x247   :  { %941 = vst [vmem:[#allocation8 + $0x70] sm:$0xff] %v857_v6  ;;  %v860_v34 = vadd.f32 %v1138_v60, %v1690_v30  ;;  %v851_v61 = vpop.f32.mrb[15].mxu1 }
 0x248   :  { %939 = vst [vmem:[#allocation8 + $0x60] sm:$0xff] %v849_v2  ;;  %v852_v0 = vadd.f32 %v1690_v30, %v851_v61 }
 0x249   :  { %942 = vst [vmem:[#allocation8 + $0x78] sm:$0xff] %v860_v34 }
 0x24a   :  { %940 = vst [vmem:[#allocation8 + $0x68] sm:$0xff] %v852_v0 }
 0x24c   :  { %v1141_v38 = vpop.f32.mrb[16].mxu1 }
 0x24d   :  { %v873_v3 = vadd.f32 %v1141_v38, %v1690_v30  ;;  %v864_v42 = vpop.f32.mrb[17].mxu1 }
 0x24e   :  { %v865_v4 = vadd.f32 %v1690_v30, %v864_v42  ;;  %v1142_v5 = vpop.f32.mrb[18].mxu1 }
 0x24f   :  { %945 = vst [vmem:[#allocation8 + $0x90] sm:$0xff] %v873_v3  ;;  %v876_v7 = vadd.f32 %v1142_v5, %v1690_v30  ;;  %v867_v18 = vpop.f32.mrb[19].mxu1 }
 0x250   :  { %943 = vst [vmem:[#allocation8 + $0x80] sm:$0xff] %v865_v4  ;;  %v868_v10 = vadd.f32 %v1690_v30, %v867_v18 }
 0x251   :  { %946 = vst [vmem:[#allocation8 + $0x98] sm:$0xff] %v876_v7 }
 0x252   :  { %944 = vst [vmem:[#allocation8 + $0x88] sm:$0xff] %v868_v10 }
 0x254   :  { %v1145_v11 = vpop.f32.mrb[20].mxu1 }
 0x255   :  { %v889_v13 = vadd.f32 %v1145_v11, %v1690_v30  ;;  %v880_v28 = vpop.f32.mrb[21].mxu1 }
 0x256   :  { %v881_v15 = vadd.f32 %v1690_v30, %v880_v28  ;;  %v1146_v22 = vpop.f32.mrb[22].mxu1 }
 0x257   :  { %949 = vst [vmem:[#allocation8 + $0xb0] sm:$0xff] %v889_v13  ;;  %v892_v20 = vadd.f32 %v1146_v22, %v1690_v30  ;;  %v883_v58 = vpop.f32.mrb[23].mxu1 }
 0x258   :  { %947 = vst [vmem:[#allocation8 + $0xa0] sm:$0xff] %v881_v15  ;;  %v884_v12 = vadd.f32 %v1690_v30, %v883_v58 }
 0x259   :  { %950 = vst [vmem:[#allocation8 + $0xb8] sm:$0xff] %v892_v20 }
 0x25a   :  { %948 = vst [vmem:[#allocation8 + $0xa8] sm:$0xff] %v884_v12 }
 0x25c   :  { %v1149_v59 = vpop.f32.mrb[24].mxu1 }
 0x25d   :  { %v905_v21 = vadd.f32 %v1149_v59, %v1690_v30  ;;  %v896_v24 = vpop.f32.mrb[25].mxu1 }
 0x25e   :  { %v897_v26 = vadd.f32 %v1690_v30, %v896_v24  ;;  %v1150_v57 = vpop.f32.mrb[26].mxu1 }
 0x25f   :  { %953 = vst [vmem:[#allocation8 + $0xd0] sm:$0xff] %v905_v21  ;;  %v908_v27 = vadd.f32 %v1150_v57, %v1690_v30  ;;  %v899_v8 = vpop.f32.mrb[27].mxu1 }
 0x260   :  { %951 = vst [vmem:[#allocation8 + $0xc0] sm:$0xff] %v897_v26  ;;  %v900_v25 = vadd.f32 %v1690_v30, %v899_v8 }
 0x261   :  { %954 = vst [vmem:[#allocation8 + $0xd8] sm:$0xff] %v908_v27 }
 0x262   :  { %952 = vst [vmem:[#allocation8 + $0xc8] sm:$0xff] %v900_v25 }
 0x264   :  { %v1153_v39 = vpop.f32.mrb[28].mxu1 }
 0x265   :  { %v921_v19 = vadd.f32 %v1153_v39, %v1690_v30  ;;  %v912_v14 = vpop.f32.mrb[29].mxu1 }
 0x266   :  { %v913_v16 = vadd.f32 %v1690_v30, %v912_v14  ;;  %v1154_v48 = vpop.f32.mrb[30].mxu1 }
 0x267   :  { %957 = vst [vmem:[#allocation8 + $0xf0] sm:$0xff] %v921_v19  ;;  %v924_v29 = vadd.f32 %v1154_v48, %v1690_v30  ;;  %v915_v36 = vpop.f32.mrb[31].mxu1 }
 0x268   :  { %955 = vst [vmem:[#allocation8 + $0xe0] sm:$0xff] %v913_v16  ;;  %v916_v31 = vadd.f32 %v1690_v30, %v915_v36 }
 0x269   :  { %958 = vst [vmem:[#allocation8 + $0xf8] sm:$0xff] %v924_v29 }
 0x26a   :  { %956 = vst [vmem:[#allocation8 + $0xe8] sm:$0xff] %v916_v31 }
 0x26b   :  { %1336 = shalt.err (!%p1333_p0)
}
 0x26c   :  { %s1337_s10 = scalar_lea.hbm %s1741_s5, 4096 }
 0x26d   :  { %p1338_p1 = scmp.ne.s32.totalorder %s1741_s5, %s1337_s10  ;;  %p1341_p2 = scmp.lt.u32.totalorder %s1337_s10, %s1741_s5 }
 0x26f   :  { %p1343_p3 = pnand %p1341_p2, %p1338_p1 }
 0x271   :  { %1346 = shalt.err (!%p1343_p3)
}
 0x272   :  { %s1359_s15 = smov 128   ;;  %s1360_s16 = smov 8  }
 0x273   :  { %970 = dma.vmem_to_hbm [thread:$0]  %s965_s6, 4096, %s1741_s5, [#allocation4], %s1359_s15, %s1359_s15, %s1360_s16  }
 0x274   :  { %1351 = dma.done.wait [#allocation4], 4096  }
 0x275   :  { %1352 = vsyncadd [#allocation4], 4294963200 }
 0x276   :  { %974 = vsyncpa [#allocation3], 1 }
 0x277   :  { %975 = vsyncpa [#allocation6], 1 }
 0x278   :  { %976 = vsyncpa [#allocation4], 1 }

</bundles_post_ra>
